<compile_context>
chip_gen: v6e
topology: v6e:2x2x1
jax: 0.10.0
libtpu: 0.0.40
codegen_flags: <defaults>
</compile_context>

<pallas_src>
import jax
import jax.numpy as jnp
from jax.experimental import pallas as pl
from jax.experimental.pallas import tpu as pltpu


def _round_up(x, m):
    return (x + m - 1) // m * m


def bengio_mlp_kernel(x_ref, w1_ref, b1_ref, w2_ref, b2_ref, o_ref):
    # x_ref: (tm, C) bf16, w1_ref: (C, H) bf16, b1_ref: (1, H) f32,
    # w2_ref: (H, tv) bf16, b2_ref: (1, tv) f32, o_ref: (tm, tv) f32.
    h = jnp.tanh(
        jnp.dot(x_ref[...], w1_ref[...], preferred_element_type=jnp.float32)
        + b1_ref[...]
    )
    logits = (
        jnp.dot(h.astype(w2_ref.dtype), w2_ref[...],
                preferred_element_type=jnp.float32)
        + b2_ref[...]
    )
    o_ref[...] = logits.astype(o_ref.dtype)


def bengio_mlp_pallas(x2d, w1, b1, w2, b2, *, tile_m=None, tile_v=None):
    """x2d: (M, C) f32; returns (M, V) f32 logits."""
    M, C = x2d.shape
    H = w1.shape[1]
    V = w2.shape[1]

    # ---- M tiling: one big block for small M, 256-row tiles otherwise. ----
    if tile_m is None:
        tile_m = _round_up(M, 8) if M <= 512 else 256
    tile_m = _round_up(tile_m, 8)
    M_pad = _round_up(M, tile_m)

    # ---- Vocab tiling: lane-dense (multiple of 128); tile when large. ----
    v128 = _round_up(V, 128)
    if tile_v is None:
        tile_v = v128 if v128 <= 2048 else 1024
    tile_v = _round_up(tile_v, 128)
    V_pad = _round_up(V, tile_v)

    # Pad + cast at the boundary: bf16 activations/weights, f32 biases.
    x_p = jnp.zeros((M_pad, C), jnp.bfloat16).at[:M, :].set(
        x2d.astype(jnp.bfloat16))
    w1_b = w1.astype(jnp.bfloat16)
    b1_f = b1.reshape(1, H).astype(jnp.float32)
    w2_p = jnp.zeros((H, V_pad), jnp.bfloat16).at[:, :V].set(
        w2.astype(jnp.bfloat16))
    b2_p = jnp.zeros((1, V_pad), jnp.float32).at[:, :V].set(
        b2.reshape(1, V).astype(jnp.float32))

    grid = (M_pad // tile_m, V_pad // tile_v)

    out = pl.pallas_call(
        bengio_mlp_kernel,
        out_shape=jax.ShapeDtypeStruct((M_pad, V_pad), jnp.float32),
        grid_spec=pltpu.PrefetchScalarGridSpec(
            num_scalar_prefetch=0,
            grid=grid,
            in_specs=[
                # Streamed activations: new tile per M step.
                pl.BlockSpec((tile_m, C), lambda i, j: (i, 0)),
                # Grid-invariant weights / biases (constant index_map ->
                # fetched once, not re-streamed per step).
                pl.BlockSpec((C, H), lambda i, j: (0, 0)),
                pl.BlockSpec((1, H), lambda i, j: (0, 0)),
                # W2 / b2 tiled along the (lane-dense) vocab axis.
                pl.BlockSpec((H, tile_v), lambda i, j: (0, j)),
                pl.BlockSpec((1, tile_v), lambda i, j: (0, j)),
            ],
            out_specs=pl.BlockSpec((tile_m, tile_v), lambda i, j: (i, j)),
        ),
        compiler_params=pltpu.CompilerParams(
            dimension_semantics=("parallel", "parallel"),
        ),
    )(x_p, w1_b, b1_f, w2_p, b2_p)
    return out[:M, :V]


def build_context_embeddings(idx, embed_table, n_context, sos_index):
    """Single-gather version of the torch roll+embed+concat.

    idx: (B, T) int32; embed_table: (vocab, d_model)
    returns: (B, T, n_context * d_model) f32
    Equivalent to embedding roll(idx, i) with the first i positions set to
    sos_index, since the embedding of that shifted index sequence is just a
    time-shift of the single embedded sequence with SOS rows in front.
    """
    B, T = idx.shape
    e = embed_table[idx]                       # ONE gather: (B, T, d_model)
    sos = embed_table[sos_index]               # (d_model,)
    d = e.shape[-1]
    ctx = [e]
    for i in range(1, n_context):
        pad = jnp.broadcast_to(sos, (B, i, d))
        ctx.append(jnp.concatenate([pad, e[:, : T - i, :]], axis=1))
    return jnp.concatenate(ctx, axis=-1)


def build_context_embeddings_roll(idx, embed_table, n_context, sos_index):
    """Literal torch semantics (roll + overwrite + repeated gather) for checking."""
    ctx = []
    for i in range(n_context):
        if i == 0:
            shifted = idx
        else:
            shifted = jnp.roll(idx, shift=i, axis=1).at[:, :i].set(sos_index)
        ctx.append(embed_table[shifted])
    return jnp.concatenate(ctx, axis=-1)


def bengio_mlp_forward(idx, params, n_context, sos_index):
    """Full forward: idx (B, T) int32 -> logits (B, T, vocab) f32."""
    embed_table, w1, b1, w2, b2 = params
    B, T = idx.shape
    x = build_context_embeddings(idx, embed_table, n_context, sos_index)
    x2d = x.reshape(B * T, x.shape[-1]).astype(jnp.float32)
    logits2d = bengio_mlp_pallas(x2d, w1, b1, w2, b2)
    return logits2d.reshape(B, T, -1)


def init_params(key, vocab, d_model, d_hidden, n_context):
    """Deterministic init matching PyTorch module shapes (weights stored
    transposed: fc1 -> (C, H), fc2 -> (H, V); biases as (1, H) / (1, V))."""
    C = n_context * d_model
    k1, k2, k3, k4, k5 = jax.random.split(key, 5)
    embed = jax.random.normal(k1, (vocab, d_model), jnp.float32) * 0.1
    w1 = jax.random.normal(k2, (C, d_hidden), jnp.float32) * (1.0 / jnp.sqrt(C))
    b1 = jax.random.normal(k3, (1, d_hidden), jnp.float32) * 0.01
    w2 = jax.random.normal(k4, (d_hidden, vocab), jnp.float32) * (1.0 / jnp.sqrt(d_hidden))
    b2 = jax.random.normal(k5, (1, vocab), jnp.float32) * 0.01
    return embed, w1, b1, w2, b2


if __name__ == "__main__":
    # Small shapes consistent with the module.
    B, T = 2, 8          # batch, sequence length
    vocab = 30           # len(tokenizer.vocab)
    d_model = 16
    d_hidden = 32
    n_context = 4
    sos_index = 0

    key = jax.random.PRNGKey(0)
    kp, ki = jax.random.split(key)
    params = init_params(kp, vocab, d_model, d_hidden, n_context)
    idx = jax.random.randint(ki, (B, T), 0, vocab, dtype=jnp.int32)

    logits = bengio_mlp_forward(idx, params, n_context, sos_index)
    logits = jax.block_until_ready(logits)
    assert logits.shape == (B, T, vocab)

    embed, w1, b1, w2, b2 = params

    # 1) The single-gather context construction matches the literal
    #    torch.roll + sos-overwrite semantics exactly.
    x_roll = build_context_embeddings_roll(idx, embed, n_context, sos_index)
    x_fast = build_context_embeddings(idx, embed, n_context, sos_index)
    assert jnp.allclose(x_roll, x_fast, atol=0.0, rtol=0.0)

    # 2) Kernel matches a pure-JAX reference using the same bf16-input /
    #    f32-accumulation arithmetic.
    x2 = x_fast.reshape(B * T, -1).astype(jnp.bfloat16)
    h_ref = jnp.tanh(
        jnp.dot(x2, w1.astype(jnp.bfloat16), preferred_element_type=jnp.float32)
        + b1.reshape(1, -1))
    ref_bf16 = (
        jnp.dot(h_ref.astype(jnp.bfloat16), w2.astype(jnp.bfloat16),
                preferred_element_type=jnp.float32)
        + b2.reshape(1, -1)).reshape(B, T, vocab)
    assert jnp.allclose(logits, ref_bf16, atol=5e-3, rtol=5e-3)

    # 3) Loose check against the full-f32 PyTorch-semantics math.
    h32 = jnp.tanh(x_roll.reshape(B * T, -1) @ w1 + b1.reshape(1, -1))
    ref_f32 = (h32 @ w2 + b2.reshape(1, -1)).reshape(B, T, vocab)
    assert jnp.allclose(logits, ref_f32, atol=5e-2, rtol=5e-2)

    print("KERNEL_OK")
</pallas_src>

<mosaic_0001>
module attributes {stable_mosaic.version = 11 : i64} {
  func.func @bengio_mlp_kernel(%arg0: i32, %arg1: i32, %arg2: memref<16x64xbf16, #tpu.memory_space<vmem>>, %arg3: memref<64x32xbf16, #tpu.memory_space<vmem>>, %arg4: memref<1x32xf32, #tpu.memory_space<vmem>>, %arg5: memref<32x128xbf16, #tpu.memory_space<vmem>>, %arg6: memref<1x128xf32, #tpu.memory_space<vmem>>, %arg7: memref<16x128xf32, #tpu.memory_space<vmem>>) attributes {dimension_semantics = [#tpu.dimension_semantics<parallel>, #tpu.dimension_semantics<parallel>], iteration_bounds = array<i64: 1, 1>, scalar_prefetch = 0 : i64, scratch_operands = 0 : i64, tpu.core_type = #tpu.core_type<tc>, window_params = [{transform_indices = @transform_0, window_bounds = array<i64: 16, 64>}, {pipeline_mode = #tpu.pipeline_mode<synchronous>, transform_indices = @transform_1, window_bounds = array<i64: 64, 32>}, {pipeline_mode = #tpu.pipeline_mode<synchronous>, transform_indices = @transform_2, window_bounds = array<i64: 1, 32>}, {transform_indices = @transform_3, window_bounds = array<i64: 32, 128>}, {transform_indices = @transform_4, window_bounds = array<i64: 1, 128>}, {transform_indices = @transform_5, window_bounds = array<i64: 16, 128>}]} {
    %c0 = arith.constant 0 : index
    %c0_0 = arith.constant 0 : index
    %0 = vector.load %arg2[%c0, %c0_0] : memref<16x64xbf16, #tpu.memory_space<vmem>>, vector<16x64xbf16>
    %c0_1 = arith.constant 0 : index
    %c0_2 = arith.constant 0 : index
    %1 = vector.load %arg3[%c0_1, %c0_2] : memref<64x32xbf16, #tpu.memory_space<vmem>>, vector<64x32xbf16>
    %cst = arith.constant dense<0.000000e+00> : vector<16x32xf32>
    %2 = tpu.matmul %0, %1, %cst {dimension_numbers = #tpu.dot_dimension_numbers<[1], [0], [0], [1], [0, 0, 1, 1], [], []>} : vector<16x64xbf16>, vector<64x32xbf16>, vector<16x32xf32> -> vector<16x32xf32>
    %c0_3 = arith.constant 0 : index
    %c0_4 = arith.constant 0 : index
    %3 = vector.load %arg4[%c0_3, %c0_4] : memref<1x32xf32, #tpu.memory_space<vmem>>, vector<1x32xf32>
    %4 = vector.broadcast %3 : vector<1x32xf32> to vector<16x32xf32>
    %5 = arith.addf %2, %4 : vector<16x32xf32>
    %6 = math.tanh %5 : vector<16x32xf32>
    %7 = arith.truncf %6 : vector<16x32xf32> to vector<16x32xbf16>
    %c0_5 = arith.constant 0 : index
    %c0_6 = arith.constant 0 : index
    %8 = vector.load %arg5[%c0_5, %c0_6] : memref<32x128xbf16, #tpu.memory_space<vmem>>, vector<32x128xbf16>
    %cst_7 = arith.constant dense<0.000000e+00> : vector<16x128xf32>
    %9 = tpu.matmul %7, %8, %cst_7 {dimension_numbers = #tpu.dot_dimension_numbers<[1], [0], [0], [1], [0, 0, 1, 1], [], []>} : vector<16x32xbf16>, vector<32x128xbf16>, vector<16x128xf32> -> vector<16x128xf32>
    %c0_8 = arith.constant 0 : index
    %c0_9 = arith.constant 0 : index
    %10 = vector.load %arg6[%c0_8, %c0_9] : memref<1x128xf32, #tpu.memory_space<vmem>>, vector<1x128xf32>
    %11 = vector.broadcast %10 : vector<1x128xf32> to vector<16x128xf32>
    %12 = arith.addf %9, %11 : vector<16x128xf32>
    %c0_10 = arith.constant 0 : index
    %c0_11 = arith.constant 0 : index
    %13 = vector.load %arg7[%c0_10, %c0_11] : memref<16x128xf32, #tpu.memory_space<vmem>>, vector<16x128xf32>
    tpu.vector_store %arg7[%c0_10, %c0_11], %12 {strides = array<i32>} : memref<16x128xf32, #tpu.memory_space<vmem>>, vector<16x128xf32>,
    return
  }
  func.func @transform_0(%arg0: i32, %arg1: i32) -> (i32, i32) {
    %c0_i32 = arith.constant 0 : i32
    %c0_i32_0 = arith.constant 0 : i32
    return %arg0, %c0_i32 : i32, i32
  }
  func.func @transform_1(%arg0: i32, %arg1: i32) -> (i32, i32) {
    %c0_i32 = arith.constant 0 : i32
    %c0_i32_0 = arith.constant 0 : i32
    %c0_i32_1 = arith.constant 0 : i32
    return %c0_i32, %c0_i32_0 : i32, i32
  }
  func.func @transform_2(%arg0: i32, %arg1: i32) -> (i32, i32) {
    %c0_i32 = arith.constant 0 : i32
    %c0_i32_0 = arith.constant 0 : i32
    %c0_i32_1 = arith.constant 0 : i32
    return %c0_i32, %c0_i32_0 : i32, i32
  }
  func.func @transform_3(%arg0: i32, %arg1: i32) -> (i32, i32) {
    %c0_i32 = arith.constant 0 : i32
    %c0_i32_0 = arith.constant 0 : i32
    return %c0_i32, %arg1 : i32, i32
  }
  func.func @transform_4(%arg0: i32, %arg1: i32) -> (i32, i32) {
    %c0_i32 = arith.constant 0 : i32
    %c0_i32_0 = arith.constant 0 : i32
    return %c0_i32, %arg1 : i32, i32
  }
  func.func @transform_5(%arg0: i32, %arg1: i32) -> (i32, i32) {
    %c0_i32 = arith.constant 0 : i32
    return %arg0, %arg1 : i32, i32
  }
}

</mosaic_0001>

<bundles_post_ra>
// kernel: tpu_custom_call.1
= control target key start
LH: loop header
LB: loop body
LE: loop exit
PB: predicated region body
PF: predicated region fallthrough
CT: control target
= control target key end

     0   :  { %v279_v1 = vmov 0.0   ;;  %vm280_vm0 = vmmov 0   ;;  %s344_s0 = inlined_call_operand.vmem [shape: bf16[16,64], index: 0, kind: input, shape index: {}]   ;;  %s345_s1 = inlined_call_operand.vmem [shape: bf16[64,32], index: 1, kind: input, shape index: {}]   ;;  %s346_s2 = inlined_call_operand.vmem [shape: f32[1,32], index: 2, kind: input, shape index: {}]   ;;  %s347_s3 = inlined_call_operand.vmem [shape: bf16[32,128], index: 3, kind: input, shape index: {}]   ;;  %s348_s4 = inlined_call_operand.vmem [shape: f32[1,128], index: 4, kind: input, shape index: {}]   ;;  %s349_s5 = inlined_call_operand.hbm [shape: f32[16,128], index: 5, kind: output, shape index: {}]  }
   0x1   :  { %v246_v0 = vld [vmem:[%s345_s1 + $0x18] sm:$0xff]   ;;  %221 = vmatprep.subr.bf16.mxu0 %v279_v1  ;;  %233 = vmatprep.subr.bf16.mxu1 %v279_v1  ;;  %v247_v2 = vld [vmem:[%s345_s1 + $0x10] sm:$0xff]   ;;  %v248_v3 = vld [vmem:[%s345_s1 + $0x8] sm:$0xff]  }
   0x2   :  { %222 = vmatpush3.bf16.msra.mxu0 %v246_v0  ;;  %229 = vmatprep.mubr.msk.bf16.mxu0 %vm280_vm0, %v279_v1 }
   0x3   :  { %223 = vmatprep.subr.bf16.mxu0 %v279_v1  ;;  %237 = vmatprep.mubr.msk.bf16.mxu1 %vm280_vm0, %v279_v1 }
   0x6   :  { %224 = vmatpush3.bf16.msra.mxu0 %v247_v2 }
   0x7   :  { %10 = vsyncpa [#allocation3], 0  ;;  %225 = vmatprep.subr.bf16.mxu0 %v279_v1  ;;  %v249_v4 = vld [vmem:[%s345_s1] sm:$0xff]   ;;  %vm68_vm1 = vcmask 523264   ;;  %v251_v6 = vld [vmem:[%s347_s3 + $0x8] sm:$0xff]   ;;  %vm139_vm2 = vcmask 261120  }
   0x8   :  { %v250_v5 = vld [vmem:[%s344_s0] sm:$0xff]   ;;  %234 = vmatpush3.bf16.msra.mxu1 %v251_v6 }
   0x9   :  { %v252_v7 = vld [vmem:[%s347_s3] sm:$0xff]   ;;  %235 = vmatprep.subr.bf16.mxu1 %v279_v1 }
   0xa   :  { %226 = vmatpush3.bf16.msra.mxu0 %v248_v3  ;;  %v202_v8 = vld [vmem:[%s346_s2] ss:$0 sm:$0xff]  ;;  %s281_s2 = smov [#allocation2]  }
   0xb   :  { %227 = vmatprep.subr.bf16.mxu0 %v279_v1  ;;  %v209_v18 = vld [vmem:[%s348_s4] ss:$0 sm:$0xff]  ;;  %s191_s8 = sshll.u32 %s281_s2, 4  ;;  %s192_s8 = int_to_ptr.vmem [resolvable:$true] %s191_s8 }
   0xc   :  { %236 = vmatpush3.bf16.msra.mxu1 %v252_v7  ;;  %s257_s9 = scalar_lea.vmem %s192_s8, 256  ;;  %p262_p1 = scmp.lt.s32.totalorder %s192_s8, %s192_s8 }
   0xd   :  { %p258_p0 = scmp.ne.s32.totalorder %s192_s8, %s257_s9  ;;  %p263_p2 = scmp.lt.s32.totalorder %s257_s9, %s257_s9 }
   0xe   :  { %228 = vmatpush3.bf16.msra.mxu0 %v249_v4 }
   0xf   :  { %p264_p3 = por %p263_p2, %p262_p1 }
  0x11   :  { %230 = vmatmul.mubr.msk.bf16.vlgmr.msra.gmra.mxu0 %vm68_vm1, %v250_v5  ;;  %p265_p4 = pnand %p264_p3, %p258_p0 }
  0xd1   :  { %v106_v9 = vpop.f32.mrf.mxu0 }
  0xd2   :  { %v107_v10 = vadd.f32 %v202_v8, %v106_v9 }
  0xd3   :  { %v231_v11 = vpop.f32.mrf.mxu0 }
  0xd4   :  { %253 = vtanh.f32 %v107_v10 }
  0xd5   :  { %v109_v12 = vpop.f32.mrf.mxu0 }
  0xd6   :  { %v110_v13 = vadd.f32 %v202_v8, %v109_v12 }
  0xd7   :  { %v232_v14 = vpop.f32.mrf.mxu0 }
  0xd8   :  { %255 = vtanh.f32 %v110_v13 }
  0xe1   :  { %v254_v15 = vpop.eup %253 }
  0xe5   :  { %v256_v16 = vpop.eup %255 }
  0xe6   :  { %v115_v17 = vpack.c.bf16 %v256_v16, %v254_v15 }
  0xe8   :  { %238 = vmatmul.mubr.msk.bf16.vlgmr.msra.gmra.mxu1 %vm139_vm2, %v115_v17 }
 0x1a8   :  { %v177_v19 = vpop.f32.mrf.mxu1 }
 0x1a9   :  { %v178_v20 = vadd.f32 %v209_v18, %v177_v19 }
 0x1aa   :  { %v239_v21 = vpop.f32.mrf.mxu1 }
 0x1ab   :  { %184 = vst [vmem:[#allocation2] sm:$0xff] %v178_v20 }
 0x1ac   :  { %v180_v22 = vpop.f32.mrf.mxu1 }
 0x1ad   :  { %v181_v23 = vadd.f32 %v209_v18, %v180_v22 }
 0x1ae   :  { %v240_v24 = vpop.f32.mrf.mxu1 }
 0x1af   :  { %185 = vst [vmem:[#allocation2 + $0x8] sm:$0xff] %v181_v23 }
 0x1b0   :  { %268 = shalt.err (!%p265_p4)
}
 0x1b1   :  { %s282_s10 = smov 128   ;;  %s283_s4 = smov 8  }
 0x1b2   :  { %197 = dma.vmem_to_hbm [thread:$0]  %s192_s8, 256, %s349_s5, [#allocation3], %s282_s10, %s282_s10, %s283_s4  }
 0x1b3   :  { %277 = dma.done.wait [#allocation3], 256  }
 0x1b4   :  { %278 = vsyncadd [#allocation3], 4294967040 }
 0x1b5   :  { %201 = vsyncpa [#allocation3], 1 }

</bundles_post_ra>
